<compile_context>
chip_gen: v7x
topology: tpu7x:2x2x1
jax: 0.10.0
libtpu: 0.0.40
codegen_flags: <defaults>
</compile_context>

<pallas_src>
import jax
import jax.numpy as jnp
from jax.experimental import pallas as pl
from jax.experimental.pallas import tpu as pltpu


def _round_up(x, m):
    return (x + m - 1) // m * m


def _vmem_limit_bytes(footprint):
    # Generous margin; capped at v7x's 64 MiB physical VMEM so the request is
    # valid on every generation (v5e/v6e have 128 MiB).
    return int(min(int(footprint * 1.5) + (16 << 20), 64 << 20))


# ----------------------------------------------------------------------------
# Linear branch:  relu(x @ w1 + b1) @ w2 + b2,  tiled over rows (M).
# ----------------------------------------------------------------------------
def _ffn_linear_kernel(x_ref, w1_ref, b1_ref, w2_ref, b2_ref, o_ref):
    # x / w1 / w2 are bf16 (MXU-native); accumulate f32; bias/ReLU in f32.
    h = jnp.dot(x_ref[...], w1_ref[...], preferred_element_type=jnp.float32)
    h = jnp.maximum(h + b1_ref[...], 0.0)
    y = jnp.dot(h.astype(jnp.bfloat16), w2_ref[...],
                preferred_element_type=jnp.float32) + b2_ref[...]
    o_ref[...] = y.astype(o_ref.dtype)


def feedforward_linear(x, w1, b1, w2, b2, *, tm=1024):
    """x: (..., H) float32.  Equivalent to the encode=None branch (eval mode)."""
    orig_shape = x.shape
    orig_dtype = x.dtype
    H = orig_shape[-1]
    F = w1.shape[1]
    Hp = _round_up(H, 128)          # lane-dense last dim for x / out
    Fp = _round_up(F, 128)          # lane-dense intermediate

    x2 = x.reshape(-1, H)
    M = x2.shape[0]

    # Row tile: multiple of 8, no larger than the padded problem, and small
    # enough that (single-buffered bf16 weights) + (double-buffered x/out
    # tiles) + (f32 intermediates) stay inside VMEM on every generation.
    tm = max(8, (int(tm) // 8) * 8)
    tm = min(tm, _round_up(M, 8))

    def _footprint(t):
        return ((Hp * Fp + Fp * Hp) * 2 + (Fp + Hp) * 4   # bf16 weights + f32 biases
                + 2 * t * Hp * 2                           # x tiles (bf16, 2 bufs)
                + 2 * t * Hp * 4                           # out tiles (f32, 2 bufs)
                + t * Fp * 4 + t * Hp * 4)                 # f32 intermediates

    while tm > 256 and _footprint(tm) > (40 << 20):
        tm //= 2
    Mp = _round_up(M, tm)

    x2p = jnp.pad(x2, ((0, Mp - M), (0, Hp - H))).astype(jnp.bfloat16)
    w1p = jnp.pad(w1, ((0, Hp - H), (0, Fp - F))).astype(jnp.bfloat16)
    w2p = jnp.pad(w2, ((0, Fp - F), (0, Hp - H))).astype(jnp.bfloat16)
    b1p = jnp.pad(b1, (0, Fp - F)).astype(jnp.float32).reshape(1, Fp)
    b2p = jnp.pad(b2, (0, Hp - H)).astype(jnp.float32).reshape(1, Hp)

    resident = pl.Buffered(1)       # constant-index operands: no double-buffer
    out = pl.pallas_call(
        _ffn_linear_kernel,
        out_shape=jax.ShapeDtypeStruct((Mp, Hp), orig_dtype),
        grid_spec=pltpu.PrefetchScalarGridSpec(
            num_scalar_prefetch=0,
            grid=(Mp // tm,),
            in_specs=[
                pl.BlockSpec((tm, Hp), lambda i: (i, 0)),                     # pipelined
                pl.BlockSpec((Hp, Fp), lambda i: (0, 0), pipeline_mode=resident),
                pl.BlockSpec((1, Fp), lambda i: (0, 0), pipeline_mode=resident),
                pl.BlockSpec((Fp, Hp), lambda i: (0, 0), pipeline_mode=resident),
                pl.BlockSpec((1, Hp), lambda i: (0, 0), pipeline_mode=resident),
            ],
            out_specs=pl.BlockSpec((tm, Hp), lambda i: (i, 0)),
        ),
        compiler_params=pltpu.CompilerParams(
            dimension_semantics=("parallel",),
            vmem_limit_bytes=_vmem_limit_bytes(_footprint(tm)),
        ),
    )(x2p, w1p, b1p, w2p, b2p)

    out = out[:M, :H]               # drop padded rows / lanes
    return out.reshape(orig_shape)


# ----------------------------------------------------------------------------
# Conv branch: both 3x3 convs fused in one kernel, NHWC, shifted-tap matmuls.
# Grid = (N, Fp//tf): the filter bank is streamed in tf-channel slices; the
# conv1 intermediate for the current slice lives in a bf16 VMEM scratch and
# conv2 accumulates across the f axis into a f32 VMEM accumulator.
# ----------------------------------------------------------------------------
def _conv_ffn_kernel(x_ref, w1_ref, b1_ref, w2_ref, b2_ref, o_ref, h_ref, acc_ref):
    # x_ref : (1, Hs+2, Ws+2, Cp)  bf16  — spatially pre-padded, channel-padded
    # w1_ref: (9, Cp, tf) bf16    b1_ref: (1, tf)  f32
    # w2_ref: (9, tf, Cp) bf16    b2_ref: (1, Cp)  f32
    # o_ref : (1, Hs, Ws, Cp)
    # h_ref : VMEM (Hs+2, Ws+2, tf) bf16   — halo-padded conv1 slice
    # acc_ref: VMEM (Hs*Ws, Cp) f32        — conv2 accumulator across f
    f = pl.program_id(1)
    n_f = pl.num_programs(1)
    Hs, Ws = o_ref.shape[1], o_ref.shape[2]
    Cp = x_ref.shape[-1]
    tf = w1_ref.shape[-1]

    @pl.when(f == 0)
    def _():
        acc_ref[...] = jnp.zeros_like(acc_ref)
        # Zero the (small, tf-sliced) h scratch once per image; only the
        # interior is rewritten each step, so the halo ring stays zero.
        h_ref[...] = jnp.zeros_like(h_ref)

    x = x_ref[0]                                     # (Hs+2, Ws+2, Cp) bf16

    # ---- conv1 for this tf-slice: 9 shifted-tap matmuls (bf16 MXU, f32 acc) --
    # TODO(synk): move the dx shifts onto the XLU via full-width matmul +
    #             pltpu.roll to avoid the sublane-offset slice copies.
    acc1 = jnp.zeros((Hs * Ws, tf), jnp.float32)
    for k in range(9):
        dy, dx = divmod(k, 3)
        xs = x[dy:dy + Hs, dx:dx + Ws, :].reshape(Hs * Ws, Cp)
        acc1 = acc1 + jnp.dot(xs, w1_ref[k], preferred_element_type=jnp.float32)
    h = jnp.maximum(acc1 + b1_ref[...], 0.0)         # bias + ReLU in f32

    # bf16 intermediate stays in VMEM (no HBM round trip); interior write only.
    h_ref[1:Hs + 1, 1:Ws + 1, :] = h.reshape(Hs, Ws, tf).astype(h_ref.dtype)

    # ---- conv2 partial product of this tf-slice, accumulated across f -------
    hp = h_ref[...]
    acc2 = jnp.zeros((Hs * Ws, Cp), jnp.float32)
    for k in range(9):
        dy, dx = divmod(k, 3)
        hs = hp[dy:dy + Hs, dx:dx + Ws, :].reshape(Hs * Ws, tf)
        acc2 = acc2 + jnp.dot(hs, w2_ref[k], preferred_element_type=jnp.float32)
    acc_ref[...] += acc2

    @pl.when(f == n_f - 1)
    def _():
        y = acc_ref[...] + b2_ref[...]
        o_ref[...] = y.reshape(1, Hs, Ws, Cp).astype(o_ref.dtype)


def _pick_tf(Fp, target=512):
    tf = min(Fp, target)
    while Fp % tf:                  # Fp is a multiple of 128, so tf=128 always works
        tf -= 128
    return tf


def feedforward_conv(x_nchw, w1, b1, w2, b2):
    """x: (N, hidden_dim, H, W).  Equivalent to the encode=True branch (eval)."""
    N, C, Hs, Ws = x_nchw.shape
    F = w1.shape[0]
    Cp = _round_up(C, 128)
    Fp = _round_up(F, 128)
    tf = _pick_tf(Fp)
    n_f = Fp // tf

    # NCHW -> NHWC once at the module boundary; spatial halo (same conv),
    # channel padding to 128 lanes, bf16 activations (MXU-native, half the DMA).
    # TODO(synk): build the halo in-kernel (DMA into a pre-zeroed scratch) to
    #             avoid the extra HBM pass of this pad.
    x = jnp.transpose(x_nchw, (0, 2, 3, 1))                       # (N,H,W,C)
    x = jnp.pad(x, ((0, 0), (1, 1), (1, 1), (0, Cp - C))).astype(jnp.bfloat16)

    # Weights (O,I,3,3) -> (3,3,I,O) -> (9,I,O), zero-padded, bf16.
    w1m = jnp.transpose(w1, (2, 3, 1, 0)).reshape(9, C, F)
    w1m = jnp.pad(w1m, ((0, 0), (0, Cp - C), (0, Fp - F))).astype(jnp.bfloat16)
    w2m = jnp.transpose(w2, (2, 3, 1, 0)).reshape(9, F, C)
    w2m = jnp.pad(w2m, ((0, 0), (0, Fp - F), (0, Cp - C))).astype(jnp.bfloat16)
    b1p = jnp.pad(b1, (0, Fp - F)).astype(jnp.float32).reshape(1, Fp)
    b2p = jnp.pad(b2, (0, Cp - C)).astype(jnp.float32).reshape(1, Cp)

    footprint = (
        2 * (Hs + 2) * (Ws + 2) * Cp * 2          # x tiles (bf16, 2 bufs)
        + 2 * 9 * Cp * tf * 2                     # w1 slices (bf16, 2 bufs)
        + 2 * 9 * tf * Cp * 2                     # w2 slices (bf16, 2 bufs)
        + 2 * tf * 4 + Cp * 4                     # biases
        + 2 * Hs * Ws * Cp * 4                    # out tiles (f32, 2 bufs)
        + (Hs + 2) * (Ws + 2) * tf * 2            # h scratch (bf16)
        + Hs * Ws * Cp * 4                        # conv2 accumulator
        + 2 * Hs * Ws * max(tf, Cp) * 4           # in-flight f32 temporaries
    )

    resident = pl.Buffered(1)
    out = pl.pallas_call(
        _conv_ffn_kernel,
        out_shape=jax.ShapeDtypeStruct((N, Hs, Ws, Cp), x_nchw.dtype),
        grid_spec=pltpu.PrefetchScalarGridSpec(
            num_scalar_prefetch=0,
            grid=(N, n_f),                         # f slices = reduction axis (last)
            in_specs=[
                pl.BlockSpec((1, Hs + 2, Ws + 2, Cp), lambda n, f: (n, 0, 0, 0)),
                pl.BlockSpec((9, Cp, tf), lambda n, f: (0, 0, f)),          # streamed
                pl.BlockSpec((1, tf), lambda n, f: (0, f)),                 # streamed
                pl.BlockSpec((9, tf, Cp), lambda n, f: (0, f, 0)),          # streamed
                pl.BlockSpec((1, Cp), lambda n, f: (0, 0), pipeline_mode=resident),
            ],
            out_specs=pl.BlockSpec((1, Hs, Ws, Cp), lambda n, f: (n, 0, 0, 0)),
            scratch_shapes=[
                pltpu.VMEM((Hs + 2, Ws + 2, tf), jnp.bfloat16),
                pltpu.VMEM((Hs * Ws, Cp), jnp.float32),
            ],
        ),
        compiler_params=pltpu.CompilerParams(
            dimension_semantics=("parallel", "arbitrary"),
            vmem_limit_bytes=_vmem_limit_bytes(footprint),
        ),
    )(x, w1m, b1p, w2m, b2p)

    out = out[..., :C]                                            # drop padded lanes
    return jnp.transpose(out, (0, 3, 1, 2))                       # back to NCHW


# ----------------------------------------------------------------------------
# Reference implementations (plain JAX, f32) for verification
# ----------------------------------------------------------------------------
def _ref_linear(x, w1, b1, w2, b2):
    h = jnp.maximum(x @ w1 + b1, 0.0)
    return h @ w2 + b2


def _ref_conv(x, w1, b1, w2, b2):
    def conv(x, w, b):
        y = jax.lax.conv_general_dilated(
            x, w, window_strides=(1, 1), padding="SAME",
            dimension_numbers=("NCHW", "OIHW", "NCHW"))
        return y + b.reshape(1, -1, 1, 1)
    h = jnp.maximum(conv(x, w1, b1), 0.0)
    return conv(h, w2, b2)


# ----------------------------------------------------------------------------
if __name__ == "__main__":
    key = jax.random.PRNGKey(0)
    hidden_dim = 32
    filter_size = 64

    # -------------------- Linear (encode=None, the default) ------------------
    B, S = 2, 8
    k = jax.random.split(key, 8)
    x_lin = jax.random.normal(k[0], (B, S, hidden_dim), jnp.float32)
    w1 = jax.random.normal(k[1], (hidden_dim, filter_size), jnp.float32) * 0.05
    b1 = jax.random.normal(k[2], (filter_size,), jnp.float32) * 0.05
    w2 = jax.random.normal(k[3], (filter_size, hidden_dim), jnp.float32) * 0.05
    b2 = jax.random.normal(k[4], (hidden_dim,), jnp.float32) * 0.05

    y_lin = jax.block_until_ready(feedforward_linear(x_lin, w1, b1, w2, b2))
    y_lin_ref = _ref_linear(x_lin, w1, b1, w2, b2)
    assert y_lin.shape == (B, S, hidden_dim)
    # bf16 MXU operands (f32 accumulation) -> looser tolerance than pure f32.
    assert jnp.allclose(y_lin, y_lin_ref, atol=2e-2, rtol=2e-2)

    # -------------------- Conv (encode=True) ---------------------------------
    N, Hs, Ws = 2, 8, 8
    x_conv = jax.random.normal(k[5], (N, hidden_dim, Hs, Ws), jnp.float32)
    cw1 = jax.random.normal(k[6], (filter_size, hidden_dim, 3, 3), jnp.float32) * 0.05
    cb1 = jnp.linspace(-0.1, 0.1, filter_size, dtype=jnp.float32)
    cw2 = jax.random.normal(k[7], (hidden_dim, filter_size, 3, 3), jnp.float32) * 0.05
    cb2 = jnp.linspace(-0.1, 0.1, hidden_dim, dtype=jnp.float32)

    y_conv = jax.block_until_ready(feedforward_conv(x_conv, cw1, cb1, cw2, cb2))
    y_conv_ref = _ref_conv(x_conv, cw1, cb1, cw2, cb2)
    assert y_conv.shape == (N, hidden_dim, Hs, Ws)
    assert jnp.allclose(y_conv, y_conv_ref, atol=5e-2, rtol=5e-2)

    print("KERNEL_OK")
</pallas_src>

<mosaic_0001>
module attributes {stable_mosaic.version = 11 : i64} {
  func.func @_ffn_linear_kernel(%arg0: i32, %arg1: memref<16x128xbf16, #tpu.memory_space<vmem>>, %arg2: memref<128x128xbf16, #tpu.memory_space<vmem>>, %arg3: memref<1x128xf32, #tpu.memory_space<vmem>>, %arg4: memref<128x128xbf16, #tpu.memory_space<vmem>>, %arg5: memref<1x128xf32, #tpu.memory_space<vmem>>, %arg6: memref<16x128xf32, #tpu.memory_space<vmem>>) attributes {dimension_semantics = [#tpu.dimension_semantics<parallel>], iteration_bounds = array<i64: 1>, scalar_prefetch = 0 : i64, scratch_operands = 0 : i64, tpu.core_type = #tpu.core_type<tc>, window_params = [{transform_indices = @transform_0, window_bounds = array<i64: 16, 128>}, {pipeline_mode = #tpu.pipeline_mode<synchronous>, transform_indices = @transform_1, window_bounds = array<i64: 128, 128>}, {pipeline_mode = #tpu.pipeline_mode<synchronous>, transform_indices = @transform_2, window_bounds = array<i64: 1, 128>}, {pipeline_mode = #tpu.pipeline_mode<synchronous>, transform_indices = @transform_3, window_bounds = array<i64: 128, 128>}, {pipeline_mode = #tpu.pipeline_mode<synchronous>, transform_indices = @transform_4, window_bounds = array<i64: 1, 128>}, {transform_indices = @transform_5, window_bounds = array<i64: 16, 128>}]} {
    %c0 = arith.constant 0 : index
    %c0_0 = arith.constant 0 : index
    %0 = vector.load %arg1[%c0, %c0_0] : memref<16x128xbf16, #tpu.memory_space<vmem>>, vector<16x128xbf16>
    %c0_1 = arith.constant 0 : index
    %c0_2 = arith.constant 0 : index
    %1 = vector.load %arg2[%c0_1, %c0_2] : memref<128x128xbf16, #tpu.memory_space<vmem>>, vector<128x128xbf16>
    %cst = arith.constant dense<0.000000e+00> : vector<16x128xf32>
    %2 = tpu.matmul %0, %1, %cst {dimension_numbers = #tpu.dot_dimension_numbers<[1], [0], [0], [1], [0, 0, 1, 1], [], []>} : vector<16x128xbf16>, vector<128x128xbf16>, vector<16x128xf32> -> vector<16x128xf32>
    %c0_3 = arith.constant 0 : index
    %c0_4 = arith.constant 0 : index
    %3 = vector.load %arg3[%c0_3, %c0_4] : memref<1x128xf32, #tpu.memory_space<vmem>>, vector<1x128xf32>
    %4 = vector.broadcast %3 : vector<1x128xf32> to vector<16x128xf32>
    %5 = arith.addf %2, %4 : vector<16x128xf32>
    %cst_5 = arith.constant 0.000000e+00 : f32
    %6 = vector.broadcast %cst_5 : f32 to vector<16x128xf32>
    %7 = arith.maximumf %5, %6 : vector<16x128xf32>
    %8 = arith.truncf %7 : vector<16x128xf32> to vector<16x128xbf16>
    %c0_6 = arith.constant 0 : index
    %c0_7 = arith.constant 0 : index
    %9 = vector.load %arg4[%c0_6, %c0_7] : memref<128x128xbf16, #tpu.memory_space<vmem>>, vector<128x128xbf16>
    %cst_8 = arith.constant dense<0.000000e+00> : vector<16x128xf32>
    %10 = tpu.matmul %8, %9, %cst_8 {dimension_numbers = #tpu.dot_dimension_numbers<[1], [0], [0], [1], [0, 0, 1, 1], [], []>} : vector<16x128xbf16>, vector<128x128xbf16>, vector<16x128xf32> -> vector<16x128xf32>
    %c0_9 = arith.constant 0 : index
    %c0_10 = arith.constant 0 : index
    %11 = vector.load %arg5[%c0_9, %c0_10] : memref<1x128xf32, #tpu.memory_space<vmem>>, vector<1x128xf32>
    %12 = vector.broadcast %11 : vector<1x128xf32> to vector<16x128xf32>
    %13 = arith.addf %10, %12 : vector<16x128xf32>
    %c0_11 = arith.constant 0 : index
    %c0_12 = arith.constant 0 : index
    %14 = vector.load %arg6[%c0_11, %c0_12] : memref<16x128xf32, #tpu.memory_space<vmem>>, vector<16x128xf32>
    tpu.vector_store %arg6[%c0_11, %c0_12], %13 {strides = array<i32>} : memref<16x128xf32, #tpu.memory_space<vmem>>, vector<16x128xf32>,
    return
  }
  func.func @transform_0(%arg0: i32) -> (i32, i32) {
    %c0_i32 = arith.constant 0 : i32
    %c0_i32_0 = arith.constant 0 : i32
    return %arg0, %c0_i32 : i32, i32
  }
  func.func @transform_1(%arg0: i32) -> (i32, i32) {
    %c0_i32 = arith.constant 0 : i32
    %c0_i32_0 = arith.constant 0 : i32
    %c0_i32_1 = arith.constant 0 : i32
    return %c0_i32, %c0_i32_0 : i32, i32
  }
  func.func @transform_2(%arg0: i32) -> (i32, i32) {
    %c0_i32 = arith.constant 0 : i32
    %c0_i32_0 = arith.constant 0 : i32
    %c0_i32_1 = arith.constant 0 : i32
    return %c0_i32, %c0_i32_0 : i32, i32
  }
  func.func @transform_3(%arg0: i32) -> (i32, i32) {
    %c0_i32 = arith.constant 0 : i32
    %c0_i32_0 = arith.constant 0 : i32
    %c0_i32_1 = arith.constant 0 : i32
    return %c0_i32, %c0_i32_0 : i32, i32
  }
  func.func @transform_4(%arg0: i32) -> (i32, i32) {
    %c0_i32 = arith.constant 0 : i32
    %c0_i32_0 = arith.constant 0 : i32
    %c0_i32_1 = arith.constant 0 : i32
    return %c0_i32, %c0_i32_0 : i32, i32
  }
  func.func @transform_5(%arg0: i32) -> (i32, i32) {
    %c0_i32 = arith.constant 0 : i32
    %c0_i32_0 = arith.constant 0 : i32
    return %arg0, %c0_i32 : i32, i32
  }
}

</mosaic_0001>

<bundles_post_ra>
// kernel: tpu_custom_call.1
= control target key start
LH: loop header
LB: loop body
LE: loop exit
PB: predicated region body
PF: predicated region fallthrough
CT: control target
= control target key end

     0   :  { %10 = vsyncpa [#allocation3], 0  ;;  %s626_s0 = inlined_call_operand.hbm [shape: bf16[16,128], index: 0, kind: input, shape index: {}]   ;;  %s627_s1 = inlined_call_operand.hbm [shape: bf16[128,128], index: 1, kind: input, shape index: {}]   ;;  %s628_s2 = inlined_call_operand.vmem [shape: f32[1,128], index: 2, kind: input, shape index: {}]   ;;  %s629_s3 = inlined_call_operand.hbm [shape: bf16[128,128], index: 3, kind: input, shape index: {}]   ;;  %s630_s4 = inlined_call_operand.vmem [shape: f32[1,128], index: 4, kind: input, shape index: {}]   ;;  %s631_s5 = inlined_call_operand.hbm [shape: f32[16,128], index: 5, kind: output, shape index: {}]  }
   0x1   :  { %11 = vsyncpa [#allocation6], 0 }
   0x2   :  { %12 = vsyncpa [#allocation4], 0  ;;  %s516_s18 = smov [#allocation5]   ;;  %s517_s20 = smov [#allocation2]  }
   0x3   :  { %s30_s19 = sshll.u32 %s516_s18, 4  ;;  %s18_s21 = sshll.u32 %s517_s20, 4  ;;  %s31_s19 = int_to_ptr.vmem [resolvable:$true] %s30_s19  ;;  %s556_s21 = int_to_ptr.vmem [resolvable:$true] %s18_s21 }
   0x4   :  { %s422_s24 = scalar_lea.hbm %s627_s1, 1024 }
   0x5   :  { %p423_p0 = scmp.ne.s32.totalorder %s627_s1, %s422_s24  ;;  %p426_p1 = scmp.lt.u32.totalorder %s422_s24, %s627_s1 }
   0x7   :  { %p428_p2 = pnand %p426_p1, %p423_p0 }
   0x9   :  { %431 = shalt.err (!%p428_p2)
}
   0xa   :  { %s432_s29 = scalar_lea.vmem %s31_s19, 1024  ;;  %p437_p4 = scmp.lt.s32.totalorder %s31_s19, %s31_s19 }
   0xb   :  { %p433_p3 = scmp.ne.s32.totalorder %s31_s19, %s432_s29  ;;  %p438_p5 = scmp.lt.s32.totalorder %s432_s29, %s432_s29 }
   0xd   :  { %p439_p6 = por %p438_p5, %p437_p4 }
   0xf   :  { %p440_p7 = pnand %p439_p6, %p433_p3 }
  0x11   :  { %443 = shalt.err (!%p440_p7)
}
  0x12   :  { %s518_s30 = smov 64   ;;  %s519_s6 = smov 4  }
  0x13   :  { %36 = dma.hbm_to_vmem [thread:$0]  %s627_s1, 1024, %s31_s19, [#allocation6], %s518_s30, %s518_s30, %s519_s6  }
  0x14   :  { %s444_s11 = scalar_lea.hbm %s626_s0, 128 }
  0x15   :  { %p445_p8 = scmp.ne.s32.totalorder %s626_s0, %s444_s11  ;;  %p448_p9 = scmp.lt.u32.totalorder %s444_s11, %s626_s0 }
  0x17   :  { %p450_p10 = pnand %p448_p9, %p445_p8 }
  0x19   :  { %453 = shalt.err (!%p450_p10)
}
  0x1a   :  { %s454_s16 = scalar_lea.vmem %s556_s21, 128  ;;  %p459_p12 = scmp.lt.s32.totalorder %s556_s21, %s556_s21 }
  0x1b   :  { %p455_p11 = scmp.ne.s32.totalorder %s556_s21, %s454_s16  ;;  %p460_p13 = scmp.lt.s32.totalorder %s454_s16, %s454_s16 }
  0x1d   :  { %p461_p0 = por %p460_p13, %p459_p12 }
  0x1f   :  { %p462_p1 = pnand %p461_p0, %p455_p11 }
  0x21   :  { %465 = shalt.err (!%p462_p1)
}
  0x22   :  { %24 = dma.hbm_to_vmem [thread:$0]  %s626_s0, 128, %s556_s21, [#allocation3], %s518_s30, %s518_s30, %s519_s6  }
  0x23   :  { %s520_s18 = smov [#allocation7]   ;;  %s466_s23 = scalar_lea.hbm %s629_s3, 1024 }
  0x24   :  { %s44_s19 = sshll.u32 %s520_s18, 4  ;;  %p467_p2 = scmp.ne.s32.totalorder %s629_s3, %s466_s23  ;;  %s45_s19 = int_to_ptr.vmem [resolvable:$true] %s44_s19 }
  0x25   :  { %p470_p3 = scmp.lt.u32.totalorder %s466_s23, %s629_s3 }
  0x27   :  { %p472_p4 = pnand %p470_p3, %p467_p2 }
  0x29   :  { %475 = shalt.err (!%p472_p4)
}
  0x2a   :  { %s476_s28 = scalar_lea.vmem %s45_s19, 1024  ;;  %p481_p6 = scmp.lt.s32.totalorder %s45_s19, %s45_s19 }
  0x2b   :  { %p477_p5 = scmp.ne.s32.totalorder %s45_s19, %s476_s28  ;;  %p482_p7 = scmp.lt.s32.totalorder %s476_s28, %s476_s28 }
  0x2d   :  { %p483_p8 = por %p482_p7, %p481_p6 }
  0x2f   :  { %p484_p9 = pnand %p483_p8, %p477_p5 }
  0x31   :  { %487 = shalt.err (!%p484_p9)
}
  0x32   :  { %50 = dma.hbm_to_vmem [thread:$0]  %s629_s3, 1024, %s45_s19, [#allocation6], %s518_s30, %s518_s30, %s519_s6  }
  0x33   :  { %510 = dma.done.wait [#allocation3], 128  }
  0x34   :  { %511 = vsyncadd [#allocation3], 4294967168 }
  0x35   :  { %512 = dma.done.wait [#allocation6], 2048  }
  0x36   :  { %513 = vsyncadd [#allocation6], 4294965248  ;;  %v521_v0 = vmov 0.0   ;;  %vm522_vm0 = vmmov 0   ;;  %v405_v1 = vld [vmem:[#allocation5] sm:$0xff]   ;;  %v406_v2 = vld [vmem:[#allocation5 + $0x8] sm:$0xff]  }
  0x37   :  { %355 = vmatprep.subr.bf16.mxu0 %v521_v0  ;;  %371 = vmatprep.mubr.msk.bf16.mxu0 %vm522_vm0, %v521_v0  ;;  %v407_v3 = vld [vmem:[#allocation5 + $0x10] sm:$0xff]   ;;  %v414_v4 = vld [vmem:[#allocation7] sm:$0xff]   ;;  %v408_v5 = vld [vmem:[#allocation5 + $0x18] sm:$0xff]   ;;  %s523_s7 = smov [#allocation8]  }
  0x38   :  { %375 = vmatprep.subr.bf16.mxu1 %v521_v0  ;;  %391 = vmatprep.mubr.msk.bf16.mxu1 %vm522_vm0, %v521_v0  ;;  %v415_v6 = vld [vmem:[#allocation7 + $0x8] sm:$0xff]   ;;  %v409_v7 = vld [vmem:[#allocation5 + $0x20] sm:$0xff]   ;;  %v416_v8 = vld [vmem:[#allocation7 + $0x10] sm:$0xff]   ;;  %s305_s8 = sshll.u32 %s523_s7, 4  ;;  %s306_s8 = int_to_ptr.vmem [resolvable:$true] %s305_s8 }
  0x39   :  { %356 = vmatpush3.bf16.msra.mxu0 %v405_v1  ;;  %376 = vmatpush3.bf16.msra.mxu1 %v414_v4  ;;  %v410_v9 = vld [vmem:[#allocation5 + $0x28] sm:$0xff]   ;;  %v417_v10 = vld [vmem:[#allocation7 + $0x18] sm:$0xff]   ;;  %v411_v11 = vld [vmem:[#allocation5 + $0x30] sm:$0xff]   ;;  %p493_p11 = scmp.lt.s32.totalorder %s306_s8, %s306_s8 }
  0x3a   :  { %357 = vmatprep.subr.bf16.mxu0 %v521_v0  ;;  %377 = vmatprep.subr.bf16.mxu1 %v521_v0  ;;  %v418_v12 = vld [vmem:[#allocation7 + $0x20] sm:$0xff]   ;;  %v412_v13 = vld [vmem:[#allocation5 + $0x38] sm:$0xff]   ;;  %v419_v14 = vld [vmem:[#allocation7 + $0x28] sm:$0xff]  }
  0x3b   :  { %v413_v15 = vld [vmem:[#allocation2] sm:$0xff]   ;;  %v420_v16 = vld [vmem:[#allocation7 + $0x30] sm:$0xff]  }
  0x3c   :  { %v421_v17 = vld [vmem:[#allocation7 + $0x38] sm:$0xff]  }
  0x3d   :  { %358 = vmatpush3.bf16.msra.mxu0 %v406_v2  ;;  %378 = vmatpush3.bf16.msra.mxu1 %v415_v6  ;;  %v318_v18 = vld [vmem:[%s628_s2] ss:$0 sm:$0xff]  ;;  %s488_s2 = scalar_lea.vmem %s306_s8, 256 }
  0x3e   :  { %359 = vmatprep.subr.bf16.mxu0 %v521_v0  ;;  %379 = vmatprep.subr.bf16.mxu1 %v521_v0  ;;  %v328_v28 = vld [vmem:[%s630_s4] ss:$0 sm:$0xff]  ;;  %p489_p10 = scmp.ne.s32.totalorder %s306_s8, %s488_s2  ;;  %p494_p12 = scmp.lt.s32.totalorder %s488_s2, %s488_s2 }
  0x40   :  { %p495_p13 = por %p494_p12, %p493_p11 }
  0x41   :  { %360 = vmatpush3.bf16.msra.mxu0 %v407_v3  ;;  %380 = vmatpush3.bf16.msra.mxu1 %v416_v8 }
  0x42   :  { %361 = vmatprep.subr.bf16.mxu0 %v521_v0  ;;  %381 = vmatprep.subr.bf16.mxu1 %v521_v0  ;;  %p496_p0 = pnand %p495_p13, %p489_p10 }
  0x45   :  { %362 = vmatpush3.bf16.msra.mxu0 %v408_v5  ;;  %382 = vmatpush3.bf16.msra.mxu1 %v417_v10 }
  0x46   :  { %363 = vmatprep.subr.bf16.mxu0 %v521_v0  ;;  %383 = vmatprep.subr.bf16.mxu1 %v521_v0 }
  0x49   :  { %364 = vmatpush3.bf16.msra.mxu0 %v409_v7  ;;  %384 = vmatpush3.bf16.msra.mxu1 %v418_v12 }
  0x4a   :  { %365 = vmatprep.subr.bf16.mxu0 %v521_v0  ;;  %385 = vmatprep.subr.bf16.mxu1 %v521_v0 }
  0x4d   :  { %366 = vmatpush3.bf16.msra.mxu0 %v410_v9  ;;  %386 = vmatpush3.bf16.msra.mxu1 %v419_v14 }
  0x4e   :  { %367 = vmatprep.subr.bf16.mxu0 %v521_v0  ;;  %387 = vmatprep.subr.bf16.mxu1 %v521_v0 }
  0x51   :  { %368 = vmatpush3.bf16.msra.mxu0 %v411_v11  ;;  %388 = vmatpush3.bf16.msra.mxu1 %v420_v16 }
  0x52   :  { %369 = vmatprep.subr.bf16.mxu0 %v521_v0  ;;  %389 = vmatprep.subr.bf16.mxu1 %v521_v0 }
  0x55   :  { %370 = vmatpush3.bf16.msra.mxu0 %v412_v13  ;;  %390 = vmatpush3.bf16.msra.mxu1 %v421_v17 }
  0x58   :  { %372 = vmatmul.mubr.bf16.vlgmr.msra.gmra.mrb[0].mxu0 %v413_v15 }
 0x12b   :  { %v176_v19 = vpop.f32.mrb[0].mxu0 }
 0x12c   :  { %v177_v20 = vadd.f32 %v318_v18, %v176_v19  ;;  %v373_v21 = vpop.f32.mrb[1].mxu0 }
 0x12d   :  { %v179_v22 = vpop.f32.mrb[2].mxu0 }
 0x12e   :  { %v180_v23 = vadd.f32 %v318_v18, %v179_v22  ;;  %v374_v24 = vpop.f32.mrb[3].mxu0  ;;  %v183_v25 = vmax.f32 %v177_v20, 0.0 }
 0x130   :  { %v184_v26 = vmax.f32 %v180_v23, 0.0 }
 0x132   :  { %v185_v27 = vpack.c.bf16 %v184_v26, %v183_v25 }
 0x134   :  { %392 = vmatmul.mubr.bf16.vlgmr.msra.gmra.mrb[0].mxu1 %v185_v27 }
 0x207   :  { %v291_v29 = vpop.f32.mrb[0].mxu1 }
 0x208   :  { %v292_v30 = vadd.f32 %v328_v28, %v291_v29  ;;  %v393_v31 = vpop.f32.mrb[1].mxu1 }
 0x209   :  { %v294_v32 = vpop.f32.mrb[2].mxu1 }
 0x20a   :  { %298 = vst [vmem:[#allocation8] sm:$0xff] %v292_v30  ;;  %v295_v33 = vadd.f32 %v328_v28, %v294_v32  ;;  %v394_v34 = vpop.f32.mrb[3].mxu1 }
 0x20c   :  { %299 = vst [vmem:[#allocation8 + $0x8] sm:$0xff] %v295_v33 }
 0x20d   :  { %499 = shalt.err (!%p496_p0)
}
 0x20e   :  { %s500_s10 = scalar_lea.hbm %s631_s5, 256 }
 0x20f   :  { %p501_p1 = scmp.ne.s32.totalorder %s631_s5, %s500_s10  ;;  %p504_p2 = scmp.lt.u32.totalorder %s500_s10, %s631_s5 }
 0x211   :  { %p506_p3 = pnand %p504_p2, %p501_p1 }
 0x213   :  { %509 = shalt.err (!%p506_p3)
}
 0x214   :  { %s524_s15 = smov 128   ;;  %s525_s16 = smov 8  }
 0x215   :  { %311 = dma.vmem_to_hbm [thread:$0]  %s306_s8, 256, %s631_s5, [#allocation4], %s524_s15, %s524_s15, %s525_s16  }
 0x216   :  { %514 = dma.done.wait [#allocation4], 256  }
 0x217   :  { %515 = vsyncadd [#allocation4], 4294967040 }
 0x218   :  { %315 = vsyncpa [#allocation3], 1 }
 0x219   :  { %316 = vsyncpa [#allocation6], 1 }
 0x21a   :  { %317 = vsyncpa [#allocation4], 1 }

</bundles_post_ra>
